<compile_context>
chip_gen: v6e
topology: v6e:2x2x1
jax: 0.10.0
libtpu: 0.0.40
codegen_flags: <defaults>
</compile_context>

<pallas_src>
import jax
import jax.numpy as jnp
from jax import lax
from jax.experimental import pallas as pl
from jax.experimental.pallas import tpu as pltpu


# Packed weight-slab layout (f32, shape (48, 10)), built once in prepare_params:
#   rows  0:12  -> conv weight, (k, c_out) with k = c_in*4 + kh*2 + kw
#   rows 12:28  -> folded FC weight for output 0, (pos, c_out)
#   rows 28:44  -> folded FC weight for output 1, (pos, c_out)
#   row  44     -> conv bias (10,)
#   row  45     -> folded FC bias in cols 0:2
SLAB_ROWS = 48
C_OUT = 10
KF = 12          # 3 in-channels * 2 * 2 kernel
P = 16           # 4 * 4 output positions


def fused_kernel(p_ref, w_ref, o_ref):
    # p_ref: (1, 16, 12) patches for this sample; w_ref: (48, 10) packed weights.
    p = p_ref[0]                      # (16, 12)
    wc = w_ref[0:12, :]               # (12, 10) conv weight (k, c_out)
    wf0 = w_ref[12:28, :]             # (16, 10) folded FC weight, output 0
    wf1 = w_ref[28:44, :]             # (16, 10) folded FC weight, output 1
    bc = w_ref[44:45, :]              # (1, 10)  conv bias
    bf = w_ref[45:46, 0:2]            # (1, 2)   folded FC bias

    # Conv2d(3,10,2,stride=2) as an unrolled VPU multiply-accumulate over K=12
    # (2,080 MACs: far below MXU fill/drain break-even), then bias + ReLU.
    acc = p[:, 0:1] * wc[0:1, :]                       # (16, 10)
    for k in range(1, KF):
        acc = acc + p[:, k:k + 1] * wc[k:k + 1, :]
    conv = jnp.maximum(acc + bc, 0.0)                  # (16, 10)

    # Folded fc1 -> Linear(5,3) -> Linear(3,2): two full reductions to scalars,
    # merged into the (1,2) output lane-wise (no concat / extra reduction pass).
    s0 = jnp.sum(conv * wf0)
    s1 = jnp.sum(conv * wf1)
    lane = lax.broadcasted_iota(jnp.int32, (1, 2), 1)
    o_ref[0] = bf + jnp.where(lane == 0, s0, s1)       # (1, 2)


def prepare_params(params):
    """One-time host-side fold of all weights into a single packed f32 slab."""
    wc, bc, w1, b1, w2, b2, w3, b3 = params
    # Conv weight -> (k, c_out), k ordered (c_in, kh, kw) to match im2col.
    wck = wc.reshape(C_OUT, KF).T                                # (12, 10)
    # Exact fold of the bias-only linear chain: out = flat @ Wt + bf.
    wt = w1.T @ w2.T @ w3.T                                      # (160, 2)
    bf = (b1 @ w2.T + b2) @ w3.T + b3                            # (2,)
    # Permute rows from PyTorch flatten order (c*16 + pos) to (pos, c) so the
    # kernel consumes the (16,10) conv tile directly (no in-kernel transpose).
    wf = wt.reshape(C_OUT, P, 2).transpose(2, 1, 0)              # (2, 16, 10)

    slab = jnp.zeros((SLAB_ROWS, C_OUT), jnp.float32)
    slab = slab.at[0:12].set(wck)
    slab = slab.at[12:28].set(wf[0])
    slab = slab.at[28:44].set(wf[1])
    slab = slab.at[44].set(bc)
    slab = slab.at[45, 0:2].set(bf)
    return slab


@jax.jit
def my_net_forward(x, wslab):
    """x: (B, 3, 8, 8) NCHW f32; wslab from prepare_params. Returns (B, 2)."""
    B, C, H, W = x.shape
    HO, WO = H // 2, W // 2
    # im2col on the data path (one fused reshape+transpose XLA op per call):
    # rows ordered (h_out, w_out), features ordered (c, kh, kw).
    patches = (x.reshape(B, C, HO, 2, WO, 2)
                 .transpose(0, 2, 4, 1, 3, 5)
                 .reshape(B, HO * WO, C * 4))                    # (B, 16, 12)

    out = pl.pallas_call(
        fused_kernel,
        out_shape=jax.ShapeDtypeStruct((B, 1, 2), jnp.float32),
        grid=(B,),
        in_specs=[
            pl.BlockSpec((1, HO * WO, C * 4), lambda b: (b, 0, 0)),
            pl.BlockSpec((SLAB_ROWS, C_OUT), lambda b: (0, 0)),   # resident
        ],
        out_specs=pl.BlockSpec((1, 1, 2), lambda b: (b, 0, 0)),
        compiler_params=pltpu.CompilerParams(
            dimension_semantics=("parallel",)),
    )(patches, wslab)
    return out.reshape(B, 2)


def _reference(x, params):
    """Pure-JAX reference mirroring the PyTorch forward, applied per sample."""
    wc, bc, w1, b1, w2, b2, w3, b3 = params
    y = lax.conv_general_dilated(
        x, wc, window_strides=(2, 2), padding="VALID",
        dimension_numbers=("NCHW", "OIHW", "NCHW"))
    y = jnp.maximum(y + bc.reshape(1, -1, 1, 1), 0.0)
    flat = y.reshape(y.shape[0], -1)               # (B, 160), c-major flatten
    h = flat @ w1.T + b1                           # (B, 5)
    h = h @ w2.T + b2                              # (B, 3)
    h = h @ w3.T + b3                              # (B, 2)
    return h


def init_params(key):
    ks = jax.random.split(key, 8)
    wc = jax.random.normal(ks[0], (10, 3, 2, 2), jnp.float32) * 0.1
    bc = jax.random.normal(ks[1], (10,), jnp.float32) * 0.1
    w1 = jax.random.normal(ks[2], (5, 160), jnp.float32) * 0.1
    b1 = jax.random.normal(ks[3], (5,), jnp.float32) * 0.1
    w2 = jax.random.normal(ks[4], (3, 5), jnp.float32) * 0.1
    b2 = jax.random.normal(ks[5], (3,), jnp.float32) * 0.1
    w3 = jax.random.normal(ks[6], (2, 3), jnp.float32) * 0.1
    b3 = jax.random.normal(ks[7], (2,), jnp.float32) * 0.1
    return (wc, bc, w1, b1, w2, b2, w3, b3)


if __name__ == "__main__":
    key = jax.random.PRNGKey(0)
    pkey, xkey = jax.random.split(key)
    params = init_params(pkey)

    # fc1 expects 160 = 10*4*4 features -> per-sample shape (3, 8, 8).
    # Batch of 8 independent samples, processed in one pallas_call via grid=(B,).
    B = 8
    x = jax.random.normal(xkey, (B, 3, 8, 8), jnp.float32)

    wslab = jax.block_until_ready(prepare_params(params))   # one-time fold
    out = jax.block_until_ready(my_net_forward(x, wslab))
    ref = jax.block_until_ready(_reference(x, params))

    assert out.shape == (B, 2)
    assert jnp.allclose(out, ref, atol=1e-4, rtol=1e-4), (out, ref)
    # TODO(synk): for very large batches, pack B*16 patch rows into a single M
    # axis and switch the conv back to an MXU matmul with bf16 operands
    # (preferred_element_type=f32) so full (>=256-row) MXU tiles are presented.
    print("KERNEL_OK")
</pallas_src>

<mosaic_0001>
module attributes {stable_mosaic.version = 11 : i64} {
  func.func @fused_kernel(%arg0: i32, %arg1: memref<1x16x12xf32, #tpu.memory_space<vmem>>, %arg2: memref<48x10xf32, #tpu.memory_space<vmem>>, %arg3: memref<1x1x2xf32, #tpu.memory_space<vmem>>) attributes {dimension_semantics = [#tpu.dimension_semantics<parallel>], iteration_bounds = array<i64: 8>, scalar_prefetch = 0 : i64, scratch_operands = 0 : i64, tpu.core_type = #tpu.core_type<tc>, window_params = [{transform_indices = @transform_0, window_bounds = array<i64: 1, 16, 12>}, {pipeline_mode = #tpu.pipeline_mode<synchronous>, transform_indices = @transform_1, window_bounds = array<i64: 48, 10>}, {transform_indices = @transform_2, window_bounds = array<i64: 1, 1, 2>}]} {
    %c0 = arith.constant 0 : index
    %c0_0 = arith.constant 0 : index
    %c0_1 = arith.constant 0 : index
    %0 = vector.load %arg1[%c0, %c0_0, %c0_1] : memref<1x16x12xf32, #tpu.memory_space<vmem>>, vector<1x16x12xf32>
    %1 = vector.shape_cast %0 : vector<1x16x12xf32> to vector<16x12xf32>
    %c0_2 = arith.constant 0 : index
    %c0_3 = arith.constant 0 : index
    %2 = vector.load %arg2[%c0_2, %c0_3] : memref<48x10xf32, #tpu.memory_space<vmem>>, vector<12x10xf32>
    %c12 = arith.constant 12 : index
    %c0_4 = arith.constant 0 : index
    %3 = vector.load %arg2[%c12, %c0_4] : memref<48x10xf32, #tpu.memory_space<vmem>>, vector<16x10xf32>
    %c28 = arith.constant 28 : index
    %c0_5 = arith.constant 0 : index
    %4 = vector.load %arg2[%c28, %c0_5] : memref<48x10xf32, #tpu.memory_space<vmem>>, vector<16x10xf32>
    %c44 = arith.constant 44 : index
    %c0_6 = arith.constant 0 : index
    %5 = vector.load %arg2[%c44, %c0_6] : memref<48x10xf32, #tpu.memory_space<vmem>>, vector<1x10xf32>
    %c45 = arith.constant 45 : index
    %c0_7 = arith.constant 0 : index
    %6 = vector.load %arg2[%c45, %c0_7] : memref<48x10xf32, #tpu.memory_space<vmem>>, vector<1x2xf32>
    %7 = vector.extract_strided_slice %1 {offsets = [0, 0], sizes = [16, 1], strides = [1, 1]} : vector<16x12xf32> to vector<16x1xf32>
    %8 = vector.extract_strided_slice %2 {offsets = [0, 0], sizes = [1, 10], strides = [1, 1]} : vector<12x10xf32> to vector<1x10xf32>
    %9 = vector.broadcast %7 : vector<16x1xf32> to vector<16x10xf32>
    %10 = vector.broadcast %8 : vector<1x10xf32> to vector<16x10xf32>
    %11 = arith.mulf %9, %10 : vector<16x10xf32>
    %12 = vector.extract_strided_slice %1 {offsets = [0, 1], sizes = [16, 1], strides = [1, 1]} : vector<16x12xf32> to vector<16x1xf32>
    %13 = vector.extract_strided_slice %2 {offsets = [1, 0], sizes = [1, 10], strides = [1, 1]} : vector<12x10xf32> to vector<1x10xf32>
    %14 = vector.broadcast %12 : vector<16x1xf32> to vector<16x10xf32>
    %15 = vector.broadcast %13 : vector<1x10xf32> to vector<16x10xf32>
    %16 = arith.mulf %14, %15 : vector<16x10xf32>
    %17 = arith.addf %11, %16 : vector<16x10xf32>
    %18 = vector.extract_strided_slice %1 {offsets = [0, 2], sizes = [16, 1], strides = [1, 1]} : vector<16x12xf32> to vector<16x1xf32>
    %19 = vector.extract_strided_slice %2 {offsets = [2, 0], sizes = [1, 10], strides = [1, 1]} : vector<12x10xf32> to vector<1x10xf32>
    %20 = vector.broadcast %18 : vector<16x1xf32> to vector<16x10xf32>
    %21 = vector.broadcast %19 : vector<1x10xf32> to vector<16x10xf32>
    %22 = arith.mulf %20, %21 : vector<16x10xf32>
    %23 = arith.addf %17, %22 : vector<16x10xf32>
    %24 = vector.extract_strided_slice %1 {offsets = [0, 3], sizes = [16, 1], strides = [1, 1]} : vector<16x12xf32> to vector<16x1xf32>
    %25 = vector.extract_strided_slice %2 {offsets = [3, 0], sizes = [1, 10], strides = [1, 1]} : vector<12x10xf32> to vector<1x10xf32>
    %26 = vector.broadcast %24 : vector<16x1xf32> to vector<16x10xf32>
    %27 = vector.broadcast %25 : vector<1x10xf32> to vector<16x10xf32>
    %28 = arith.mulf %26, %27 : vector<16x10xf32>
    %29 = arith.addf %23, %28 : vector<16x10xf32>
    %30 = vector.extract_strided_slice %1 {offsets = [0, 4], sizes = [16, 1], strides = [1, 1]} : vector<16x12xf32> to vector<16x1xf32>
    %31 = vector.extract_strided_slice %2 {offsets = [4, 0], sizes = [1, 10], strides = [1, 1]} : vector<12x10xf32> to vector<1x10xf32>
    %32 = vector.broadcast %30 : vector<16x1xf32> to vector<16x10xf32>
    %33 = vector.broadcast %31 : vector<1x10xf32> to vector<16x10xf32>
    %34 = arith.mulf %32, %33 : vector<16x10xf32>
    %35 = arith.addf %29, %34 : vector<16x10xf32>
    %36 = vector.extract_strided_slice %1 {offsets = [0, 5], sizes = [16, 1], strides = [1, 1]} : vector<16x12xf32> to vector<16x1xf32>
    %37 = vector.extract_strided_slice %2 {offsets = [5, 0], sizes = [1, 10], strides = [1, 1]} : vector<12x10xf32> to vector<1x10xf32>
    %38 = vector.broadcast %36 : vector<16x1xf32> to vector<16x10xf32>
    %39 = vector.broadcast %37 : vector<1x10xf32> to vector<16x10xf32>
    %40 = arith.mulf %38, %39 : vector<16x10xf32>
    %41 = arith.addf %35, %40 : vector<16x10xf32>
    %42 = vector.extract_strided_slice %1 {offsets = [0, 6], sizes = [16, 1], strides = [1, 1]} : vector<16x12xf32> to vector<16x1xf32>
    %43 = vector.extract_strided_slice %2 {offsets = [6, 0], sizes = [1, 10], strides = [1, 1]} : vector<12x10xf32> to vector<1x10xf32>
    %44 = vector.broadcast %42 : vector<16x1xf32> to vector<16x10xf32>
    %45 = vector.broadcast %43 : vector<1x10xf32> to vector<16x10xf32>
    %46 = arith.mulf %44, %45 : vector<16x10xf32>
    %47 = arith.addf %41, %46 : vector<16x10xf32>
    %48 = vector.extract_strided_slice %1 {offsets = [0, 7], sizes = [16, 1], strides = [1, 1]} : vector<16x12xf32> to vector<16x1xf32>
    %49 = vector.extract_strided_slice %2 {offsets = [7, 0], sizes = [1, 10], strides = [1, 1]} : vector<12x10xf32> to vector<1x10xf32>
    %50 = vector.broadcast %48 : vector<16x1xf32> to vector<16x10xf32>
    %51 = vector.broadcast %49 : vector<1x10xf32> to vector<16x10xf32>
    %52 = arith.mulf %50, %51 : vector<16x10xf32>
    %53 = arith.addf %47, %52 : vector<16x10xf32>
    %54 = vector.extract_strided_slice %1 {offsets = [0, 8], sizes = [16, 1], strides = [1, 1]} : vector<16x12xf32> to vector<16x1xf32>
    %55 = vector.extract_strided_slice %2 {offsets = [8, 0], sizes = [1, 10], strides = [1, 1]} : vector<12x10xf32> to vector<1x10xf32>
    %56 = vector.broadcast %54 : vector<16x1xf32> to vector<16x10xf32>
    %57 = vector.broadcast %55 : vector<1x10xf32> to vector<16x10xf32>
    %58 = arith.mulf %56, %57 : vector<16x10xf32>
    %59 = arith.addf %53, %58 : vector<16x10xf32>
    %60 = vector.extract_strided_slice %1 {offsets = [0, 9], sizes = [16, 1], strides = [1, 1]} : vector<16x12xf32> to vector<16x1xf32>
    %61 = vector.extract_strided_slice %2 {offsets = [9, 0], sizes = [1, 10], strides = [1, 1]} : vector<12x10xf32> to vector<1x10xf32>
    %62 = vector.broadcast %60 : vector<16x1xf32> to vector<16x10xf32>
    %63 = vector.broadcast %61 : vector<1x10xf32> to vector<16x10xf32>
    %64 = arith.mulf %62, %63 : vector<16x10xf32>
    %65 = arith.addf %59, %64 : vector<16x10xf32>
    %66 = vector.extract_strided_slice %1 {offsets = [0, 10], sizes = [16, 1], strides = [1, 1]} : vector<16x12xf32> to vector<16x1xf32>
    %67 = vector.extract_strided_slice %2 {offsets = [10, 0], sizes = [1, 10], strides = [1, 1]} : vector<12x10xf32> to vector<1x10xf32>
    %68 = vector.broadcast %66 : vector<16x1xf32> to vector<16x10xf32>
    %69 = vector.broadcast %67 : vector<1x10xf32> to vector<16x10xf32>
    %70 = arith.mulf %68, %69 : vector<16x10xf32>
    %71 = arith.addf %65, %70 : vector<16x10xf32>
    %72 = vector.extract_strided_slice %1 {offsets = [0, 11], sizes = [16, 1], strides = [1, 1]} : vector<16x12xf32> to vector<16x1xf32>
    %73 = vector.extract_strided_slice %2 {offsets = [11, 0], sizes = [1, 10], strides = [1, 1]} : vector<12x10xf32> to vector<1x10xf32>
    %74 = vector.broadcast %72 : vector<16x1xf32> to vector<16x10xf32>
    %75 = vector.broadcast %73 : vector<1x10xf32> to vector<16x10xf32>
    %76 = arith.mulf %74, %75 : vector<16x10xf32>
    %77 = arith.addf %71, %76 : vector<16x10xf32>
    %78 = vector.broadcast %5 : vector<1x10xf32> to vector<16x10xf32>
    %79 = arith.addf %77, %78 : vector<16x10xf32>
    %cst = arith.constant 0.000000e+00 : f32
    %80 = vector.broadcast %cst : f32 to vector<16x10xf32>
    %81 = arith.maximumf %79, %80 : vector<16x10xf32>
    %82 = arith.mulf %81, %3 : vector<16x10xf32>
    %83 = vector.shape_cast %82 : vector<16x10xf32> to vector<1x16x10xf32>
    %cst_8 = arith.constant dense<0.000000e+00> : vector<1xf32>
    %84 = vector.multi_reduction <add>, %83, %cst_8 [1, 2] : vector<1x16x10xf32> to vector<1xf32>
    %85 = vector.shape_cast %84 : vector<1xf32> to vector<1x1x1xf32>
    %86 = vector.extract %85[0, 0, 0] : f32 from vector<1x1x1xf32>
    %87 = arith.mulf %81, %4 : vector<16x10xf32>
    %88 = vector.shape_cast %87 : vector<16x10xf32> to vector<1x16x10xf32>
    %cst_9 = arith.constant dense<0.000000e+00> : vector<1xf32>
    %89 = vector.multi_reduction <add>, %88, %cst_9 [1, 2] : vector<1x16x10xf32> to vector<1xf32>
    %90 = vector.shape_cast %89 : vector<1xf32> to vector<1x1x1xf32>
    %91 = vector.extract %90[0, 0, 0] : f32 from vector<1x1x1xf32>
    %92 = tpu.iota {dimensions = array<i32: 1>} : vector<1x2xi32>
    %c0_i32 = arith.constant 0 : i32
    %93 = vector.broadcast %c0_i32 : i32 to vector<1x2xi32>
    %94 = arith.cmpi eq, %92, %93 : vector<1x2xi32>
    %95 = vector.broadcast %86 : f32 to vector<1x2xf32>
    %96 = vector.broadcast %91 : f32 to vector<1x2xf32>
    %97 = arith.select %94, %95, %96 : vector<1x2xi1>, vector<1x2xf32>
    %98 = arith.addf %6, %97 : vector<1x2xf32>
    %c0_10 = arith.constant 0 : index
    %c0_11 = arith.constant 0 : index
    %c0_12 = arith.constant 0 : index
    %99 = vector.load %arg3[%c0_10, %c0_11, %c0_12] : memref<1x1x2xf32, #tpu.memory_space<vmem>>, vector<1x1x2xf32>
    %100 = vector.shape_cast %99 : vector<1x1x2xf32> to vector<1x2xf32>
    %101 = vector.shape_cast %98 : vector<1x2xf32> to vector<1x1x2xf32>
    tpu.vector_store %arg3[%c0_10, %c0_11, %c0_12], %101 {strides = array<i32>} : memref<1x1x2xf32, #tpu.memory_space<vmem>>, vector<1x1x2xf32>,
    return
  }
  func.func @transform_0(%arg0: i32) -> (i32, i32, i32) {
    %c0_i32 = arith.constant 0 : i32
    %c0_i32_0 = arith.constant 0 : i32
    %c0_i32_1 = arith.constant 0 : i32
    return %arg0, %c0_i32, %c0_i32_0 : i32, i32, i32
  }
  func.func @transform_1(%arg0: i32) -> (i32, i32) {
    %c0_i32 = arith.constant 0 : i32
    %c0_i32_0 = arith.constant 0 : i32
    %c0_i32_1 = arith.constant 0 : i32
    return %c0_i32, %c0_i32_0 : i32, i32
  }
  func.func @transform_2(%arg0: i32) -> (i32, i32, i32) {
    %c0_i32 = arith.constant 0 : i32
    %c0_i32_0 = arith.constant 0 : i32
    %c0_i32_1 = arith.constant 0 : i32
    return %arg0, %c0_i32, %c0_i32_0 : i32, i32, i32
  }
}

</mosaic_0001>

<bundles_post_ra>
// kernel: my_net_forward.1
= control target key start
LH: loop header
LB: loop body
LE: loop exit
PB: predicated region body
PF: predicated region fallthrough
CT: control target
= control target key end

     0   :  { %s524_s9 = smov 0   ;;  %s581_s0 = inlined_call_operand.vmem [shape: f32[8,16,12], index: 0, kind: input, shape index: {}]   ;;  %s582_s1 = inlined_call_operand.vmem [shape: f32[48,10], index: 1, kind: input, shape index: {}]   ;;  %s583_s2 = inlined_call_operand.vmem [shape: f32[8,1,2], index: 2, kind: output, shape index: {}]  }
   0x1 LB: > { %s435_s10 = sadd.s32 4294967295, %s495_s9   ;;  %p439_p0 = scmp.ge.s32.totalorder %s495_s9, 1  ;;  %s495_s9 = sphi %s524_s9, %s12_s9  }
   0x2   : > { %p112_p1 = scmp.lt.s32.totalorder %s495_s9, 9 }
   0x4   : > { %p113_p2 = pnand %p439_p0, %p112_p1 }
   0x5   : > { %p132_p3 = scmp.lt.s32.totalorder (!%p113_p2), %s435_s10, 7 }
   0x6   : > { %116 = sbr.rel (%p113_p2) target bundleno = 424 (0x1a8), region = 28 }
   0xb   : > { %v497_v0 = vmov 1   ;;  %v498_v1 = vmov 0   ;;  %s585_s10 = smov (!%p132_p3, %s435_s10), 7  ;;  %v499_v4 = vmov 2   ;;  %v500_v5 = vmov 3   ;;  %v142_v26 = vld [vmem:[%s582_s1] sm:$0xff] }
   0xc   : > { %471 = vset.pattern.permute.xlu1 %v497_v0  ;;  %470 = vset.pattern.permute.xlu0 %v498_v1  ;;  %s445_s11 = sshll.u32 %s585_s10, 4  ;;  %v501_v6 = vmov 4   ;;  %v502_v7 = vmov 5   ;;  %v503_v8 = vmov 6   ;;  %v504_v9 = vmov 8   ;;  %s139_s7 = scalar_lea.vmem %s583_s2, %s585_s10 }
   0xd   : > { %s136_s14 = scalar_lea.vmem %s581_s0, %s445_s11  ;;  %v505_v10 = vmov 9   ;;  %v506_v11 = vmov 7   ;;  %v507_v12 = vmov 11   ;;  %v508_v13 = vmov 10   ;;  %v143_v0 = vld [vmem:[%s582_s1 + $0x8] sm:$0xf] }
   0xe   : > { %v140_v2 = vld [vmem:[%s136_s14] sm:$0xff]  ;;  %v141_v3 = vld [vmem:[%s136_s14 + $0x8] sm:$0xff]  ;;  %v160_v19 = vlaneseq  ;;  %vm352_vm0 = vcmask 80896   ;;  %vm386_vm2 = vcmask 8192  }
   0xf   : > { %167 = vperm.xlu1 %471, %v140_v2   ;;  %152 = vperm.xlu0 %470, %v140_v2  }
  0x10   : > { %v539_v21 = vshrl.u32 %v160_v19, 7 }
  0x12   : > { %v176_v24 = vsub.s32 1, %v539_v21  ;;  %v162_v25 = vsub.s32 0, %v539_v21  ;;  %v192_v27 = vsub.s32 2, %v539_v21  ;;  %v208_v32 = vsub.s32 3, %v539_v21 }
  0x13   : > { %171 = vperm.xlu1 %471, %v141_v3   ;;  %157 = vperm.xlu0 %470, %v141_v3   ;;  %v224_v34 = vsub.s32 4, %v539_v21  ;;  %v240_v40 = vsub.s32 5, %v539_v21  ;;  %v256_v50 = vsub.s32 6, %v539_v21  ;;  %v272_v51 = vsub.s32 7, %v539_v21 }
  0x14   : > { %v177_v30 = vrot.slane %v142_v26, %v176_v24  ;;  %v163_v31 = vrot.slane %v142_v26, %v162_v25  ;;  %v193_v33 = vrot.slane %v142_v26, %v192_v27  ;;  %v209_v38 = vrot.slane %v142_v26, %v208_v32 }
  0x15   : > { %v225_v42 = vrot.slane %v142_v26, %v224_v34  ;;  %v241_v46 = vrot.slane %v142_v26, %v240_v40  ;;  %v257_v60 = vrot.slane %v142_v26, %v256_v50  ;;  %v273_v61 = vrot.slane %v142_v26, %v272_v51  ;;  %v442_v40 = vld [vmem:[%s582_s1 + $0x2c] ss:$0 sm:$0xff]  ;;  %v147_v51 = vld [vmem:[%s582_s1 + $0x24] sm:$0xff] }
  0x16   : > { %v337_v26 = vrot.slane %v143_v0, %v208_v32 }
  0x17   : > { %473 = vset.pattern.permute.xlu1 %v499_v4  ;;  %472 = vset.pattern.permute.xlu0 %v499_v4 }
  0x18   : > { %187 = vperm.xlu1 %473, %v141_v3   ;;  %183 = vperm.xlu0 %472, %v140_v2  }
  0x1c   : > { %474 = vset.pattern.permute.xlu1 %v500_v5  ;;  %475 = vset.pattern.permute.xlu0 %v500_v5 }
  0x1d   : > { %199 = vperm.xlu1 %474, %v140_v2   ;;  %203 = vperm.xlu0 %475, %v141_v3  }
  0x21   : > { %476 = vset.pattern.permute.xlu1 %v501_v6  ;;  %477 = vset.pattern.permute.xlu0 %v502_v7 }
  0x22   : > { %215 = vperm.xlu1 %476, %v140_v2   ;;  %231 = vperm.xlu0 %477, %v140_v2  }
  0x26   : > { %219 = vperm.xlu1 %476, %v141_v3   ;;  %480 = vset.pattern.permute.xlu0 %v503_v8 }
  0x27   : > { %251 = vperm.xlu0 %480, %v141_v3  }
  0x2a   : > { %478 = vset.pattern.permute.xlu1 %v502_v7 }
  0x2b   : > { %235 = vperm.xlu1 %478, %v141_v3   ;;  %482 = vset.pattern.permute.xlu0 %v504_v9 }
  0x2c   : > { %279 = vperm.xlu0 %482, %v140_v2  }
  0x2f   : > { %479 = vset.pattern.permute.xlu1 %v503_v8  ;;  %v289_v8 = vrot.slane %v143_v0, %v162_v25 }
  0x30   : > { %247 = vperm.xlu1 %479, %v140_v2   ;;  %485 = vset.pattern.permute.xlu0 %v505_v10 }
  0x31   : > { %299 = vperm.xlu0 %485, %v141_v3  }
  0x34   : > { %481 = vset.pattern.permute.xlu1 %v506_v11 }
  0x35   : > { %263 = vperm.xlu1 %481, %v140_v2   ;;  %487 = vset.pattern.permute.xlu0 %v507_v12 }
  0x36   : > { %327 = vperm.xlu0 %487, %v140_v2  }
  0x39   : > { %267 = vperm.xlu1 %481, %v141_v3  }
  0x3d   : > { %483 = vset.pattern.permute.xlu1 %v504_v9 }
  0x3e   : > { %283 = vperm.xlu1 %483, %v141_v3  }
  0x42   : > { %484 = vset.pattern.permute.xlu1 %v505_v10 }
  0x43   : > { %295 = vperm.xlu1 %484, %v140_v2  }
  0x47   : > { %486 = vset.pattern.permute.xlu1 %v508_v13 }
  0x48   : > { %311 = vperm.xlu1 %486, %v140_v2  }
  0x4c   : > { %315 = vperm.xlu1 %486, %v141_v3  }
  0x50   : > { %488 = vset.pattern.permute.xlu1 %v507_v12 }
  0x51   : > { %331 = vperm.xlu1 %488, %v141_v3  }
  0x8a   : > { %v168_v14 = vpop.permute.xlu1 %167  ;;  %v153_v18 = vpop.permute.xlu0 %152 }
  0x8b   : > { %v178_v36 = vmul.f32 %v177_v30, %v168_v14  ;;  %v164_v37 = vmul.f32 %v163_v31, %v153_v18 }
  0x8d   : > { %v180_v43 = vadd.f32 %v178_v36, %v164_v37 }
  0x8e   : > { %v172_v15 = vpop.permute.xlu1 %171  ;;  %v158_v22 = vpop.permute.xlu0 %157 }
  0x8f   : > { %v179_v52 = vmul.f32 %v177_v30, %v172_v15  ;;  %v165_v53 = vmul.f32 %v163_v31, %v158_v22  ;;  %v321_v22 = vrot.slane %v143_v0, %v192_v27 }
  0x91   : > { %v181_v62 = vadd.f32 %v179_v52, %v165_v53  ;;  %v145_v52 = vld [vmem:[%s582_s1 + $0x14] sm:$0xff] }
  0x93   : > { %v188_v16 = vpop.permute.xlu1 %187  ;;  %v184_v29 = vpop.permute.xlu0 %183 }
  0x94   : > { %v194_v41 = vmul.f32 %v193_v33, %v184_v29  ;;  %v195_v56 = vmul.f32 %v193_v33, %v188_v16  ;;  %v305_v16 = vrot.slane %v143_v0, %v176_v24 }
  0x96   : > { %v196_v48 = vadd.f32 %v194_v41, %v180_v43  ;;  %v197_v2 = vadd.f32 %v195_v56, %v181_v62 }
  0x98   : > { %v200_v17 = vpop.permute.xlu1 %199  ;;  %v204_v39 = vpop.permute.xlu0 %203 }
  0x99   : > { %v210_v44 = vmul.f32 %v209_v38, %v200_v17  ;;  %v211_v63 = vmul.f32 %v209_v38, %v204_v39 }
  0x9b   : > { %v212_v54 = vadd.f32 %v210_v44, %v196_v48  ;;  %v213_v9 = vadd.f32 %v211_v63, %v197_v2  ;;  %v146_v48 = vld [vmem:[%s582_s1 + $0x1c] sm:$0xff] }
  0x9d   : > { %v216_v20 = vpop.permute.xlu1 %215  ;;  %v232_v47 = vpop.permute.xlu0 %231 }
  0x9e   : > { %v226_v49 = vmul.f32 %v225_v42, %v216_v20  ;;  %v242_v59 = vmul.f32 %v241_v46, %v232_v47 }
  0xa0   : > { %v228_v58 = vadd.f32 %v226_v49, %v212_v54  ;;  %v144_v49 = vld [vmem:[%s582_s1 + $0xc] sm:$0xff] }
  0xa1   : > { %v220_v23 = vpop.permute.xlu1 %219 }
  0xa2   : > { %v252_v57 = vpop.permute.xlu0 %251  ;;  %v227_v3 = vmul.f32 %v225_v42, %v220_v23  ;;  %v244_v6 = vadd.f32 %v242_v59, %v228_v58 }
  0xa3   : > { %v259_v20 = vmul.f32 %v257_v60, %v252_v57 }
  0xa4   : > { %v229_v12 = vadd.f32 %v227_v3, %v213_v9 }
  0xa6   : > { %v236_v28 = vpop.permute.xlu1 %235 }
  0xa7   : > { %v280_v4 = vpop.permute.xlu0 %279  ;;  %v243_v10 = vmul.f32 %v241_v46, %v236_v28 }
  0xa8   : > { %v290_v15 = vmul.f32 %v289_v8, %v280_v4 }
  0xa9   : > { %v245_v18 = vadd.f32 %v243_v10, %v229_v12 }
  0xab   : > { %v248_v35 = vpop.permute.xlu1 %247  ;;  %v261_v31 = vadd.f32 %v259_v20, %v245_v18 }
  0xac   : > { %v258_v1 = vmul.f32 %v257_v60, %v248_v35  ;;  %v300_v13 = vpop.permute.xlu0 %299 }
  0xad   : > { %v307_v39 = vmul.f32 %v305_v16, %v300_v13 }
  0xae   : > { %v260_v11 = vadd.f32 %v258_v1, %v244_v6 }
  0xb0   : > { %v264_v45 = vpop.permute.xlu1 %263 }
  0xb1   : > { %v274_v7 = vmul.f32 %v273_v61, %v264_v45  ;;  %v328_v29 = vpop.permute.xlu0 %327 }
  0xb2   : > { %v338_v35 = vmul.f32 %v337_v26, %v328_v29 }
  0xb3   : > { %v276_v14 = vadd.f32 %v274_v7, %v260_v11 }
  0xb4   : > { %v268_v55 = vpop.permute.xlu1 %267 }
  0xb5   : > { %v275_v23 = vmul.f32 %v273_v61, %v268_v55  ;;  %v292_v30 = vadd.f32 %v290_v15, %v276_v14  ;;  %v380_v14 = vand.u32 127, %v160_v19 }
  0xb7   : > { %v277_v36 = vadd.f32 %v275_v23, %v261_v31  ;;  %vm381_vm1 = vcmp.eq.s32.totalorder %v380_v14, 0 }
  0xb9   : > { %v284_v5 = vpop.permute.xlu1 %283 }
  0xba   : > { %v291_v33 = vmul.f32 %v289_v8, %v284_v5 }
  0xbc   : > { %v293_v38 = vadd.f32 %v291_v33, %v277_v36 }
  0xbe   : > { %v296_v17 = vpop.permute.xlu1 %295  ;;  %v309_v41 = vadd.f32 %v307_v39, %v293_v38 }
  0xbf   : > { %v306_v21 = vmul.f32 %v305_v16, %v296_v17  ;;  %v149_v16 = vld [vmem:[%s582_s1 + $0x2d] sm:$0x1] }
  0xc1   : > { %v308_v34 = vadd.f32 %v306_v21, %v292_v30 }
  0xc3   : > { %v312_v25 = vpop.permute.xlu1 %311 }
  0xc4   : > { %v322_v28 = vmul.f32 %v321_v22, %v312_v25 }
  0xc6   : > { %v324_v37 = vadd.f32 %v322_v28, %v308_v34 }
  0xc7   : > { %v316_v24 = vpop.permute.xlu1 %315 }
  0xc8   : > { %v340_v27 = vadd.f32 %v338_v35, %v324_v37  ;;  %v323_v32 = vmul.f32 %v321_v22, %v316_v24 }
  0xca   : > { %v346_v42 = vadd.f32 %v442_v40, %v340_v27  ;;  %v325_v44 = vadd.f32 %v323_v32, %v309_v41 }
  0xcc   : > { %v332_v43 = vpop.permute.xlu1 %331  ;;  %v348_v46 = vmax.f32 %v346_v42, 0.0 }
  0xcd   : > { %v339_v45 = vmul.f32 %v337_v26, %v332_v43 }
  0xce   : > { %v365_v54 = vmul.f32 %v348_v46, %v146_v48  ;;  %v350_v55 = vmul.f32 %v348_v46, %v144_v49 }
  0xcf   : > { %v341_v47 = vadd.f32 %v339_v45, %v325_v44 }
  0xd0   : > { %v367_v58 = vsel %vm352_vm0, %v365_v54, 0.0  ;;  %v353_v60 = vsel %vm352_vm0, %v350_v55, 0.0 }
  0xd1   : > { %v347_v50 = vadd.f32 %v442_v40, %v341_v47 }
  0xd3   : > { %v349_v53 = vmax.f32 %v347_v50, 0.0 }
  0xd5   : > { %v366_v56 = vmul.f32 %v349_v53, %v147_v51  ;;  %v351_v57 = vmul.f32 %v349_v53, %v145_v52 }
  0xd7   : > { %v368_v59 = vsel %vm352_vm0, %v366_v56, 0.0  ;;  %v354_v61 = vsel %vm352_vm0, %v351_v57, 0.0 }
  0xd8   : > { %v369_v62 = vadd.f32 %v368_v59, %v367_v58  ;;  %v355_v63 = vadd.f32 %v354_v61, %v353_v60 }
  0xda   : > { %370 = vadd.xlane.f32.xlu0 %v369_v62  ;;  %356 = vadd.xlane.f32.xlu1 %v355_v63 }
 0x163   : > { %v371_v0 = vpop.xlane.xlu0 %370  ;;  %v357_v1 = vpop.xlane.xlu1 %356 }
 0x164   : > { %v372_v2 = vrot.slane %v371_v0, 4  ;;  %v358_v3 = vrot.slane %v357_v1, 4 }
 0x166   : > { %v373_v4 = vadd.f32 %v372_v2, %v371_v0  ;;  %v359_v5 = vadd.f32 %v358_v3, %v357_v1 }
 0x168   : > { %v374_v6 = vrot.slane %v373_v4, 2  ;;  %v360_v7 = vrot.slane %v359_v5, 2 }
 0x16a   : > { %v375_v8 = vadd.f32 %v374_v6, %v373_v4  ;;  %v361_v9 = vadd.f32 %v360_v7, %v359_v5 }
 0x16c   : > { %v362_v10 = vrot.slane %v361_v9, 1  ;;  %v376_v11 = vrot.slane %v375_v8, 1 }
 0x16e   : > { %v363_v12 = vadd.f32 %v362_v10, %v361_v9  ;;  %v377_v13 = vadd.f32 %v376_v11, %v375_v8 }
 0x170   : > { %446 = vpush %v363_v12 }
 0x171   : > { %448 = vpush %v377_v13 }
 0x1a1   : > { %s447_s29 = spop %446 }
 0x1a2   : > { %v382_v15 = vstv %s447_s29  ;;  %s449_s4 = spop %448 }
 0x1a3   : > { %v383_v17 = vstv %s449_s4 }
 0x1a4   : > { %v384_v18 = vsel %vm381_vm1, %v382_v15, %v383_v17 }
 0x1a5   : > { %v385_v20 = vadd.f32 %v384_v18, %v149_v16 }
 0x1a7   : > { %387 = vst.msk [vmem:[%s139_s7] sm:$0x1] %vm386_vm2, %v385_v20 }
 0x1a8 PF: > { %s12_s9 = sadd.s32 1, %s495_s9  }
 0x1a9   : > { %p9_p4 = scmp.ge.s32.totalorder %s12_s9, 10  }
 0x1ab   :  { %11 = sbr.rel (!%p9_p4) target bundleno = 1 (0x1), region = 58 }

</bundles_post_ra>
